<compile_context>
chip_gen: v5e
topology: v5e:2x2
jax: 0.10.0
libtpu: 0.0.40
codegen_flags: <defaults>
</compile_context>

<pallas_src>
import jax
import jax.numpy as jnp
from jax.experimental import pallas as pl
from jax.experimental.pallas import tpu as pltpu

STATE_SIZE = 16
IN_CH = STATE_SIZE * 3        # 48
HIDDEN = 128
OUT_CH = STATE_SIZE           # 16

_MAX_IMAGES_PER_STEP = 16     # cap on the in-kernel unroll when packing images
_DEFAULT_MAX_LANES = 16 * 1024  # pixels (lanes) of work per grid step
                                # (f32 footprint ~8 MiB double-buffered: fits the
                                #  scoped-VMEM default on v5e/v6e/v7x)


def _update_net_kernel(x_ref, w1_ref, w2_ref, o_ref):
    """One grid step: out = W2 @ relu(W1 @ x) for one (or a few) image tiles.

    x_ref:  (IN_CH, T) or (nb, IN_CH, T)   channels on sublanes, pixels on lanes
    w1_ref: (HIDDEN, IN_CH)                torch (out, in) layout
    w2_ref: (OUT_CH, HIDDEN)
    o_ref:  (OUT_CH, T) or (nb, OUT_CH, T)
    """
    w1 = w1_ref[...]
    w2 = w2_ref[...]

    def one_image(x):                       # (IN_CH, T) -> (OUT_CH, T) in f32
        h = jnp.dot(w1, x, preferred_element_type=jnp.float32)
        h = jnp.maximum(h, 0.0)             # ReLU
        return jnp.dot(w2, h.astype(w2.dtype),
                       preferred_element_type=jnp.float32)

    if len(x_ref.shape) == 2:               # batch dim squeezed away (nb == 1)
        o_ref[...] = one_image(x_ref[...]).astype(o_ref.dtype)
    else:                                   # (nb, IN_CH, T): small-image packing
        for b in range(x_ref.shape[0]):     # static unroll, nb <= 16
            o_ref[b] = one_image(x_ref[b]).astype(o_ref.dtype)


def _choose_tiling(N, HW, max_lanes):
    """Pick (nb, hw_tile): images and pixels handled per grid step.

    - hw_tile is a multiple of 128 (lane-dense stores), as large as possible
      up to the lane budget.
    - For small images we pack several per step (nb > 1) so each grid step
      moves enough bytes to amortise the ~0.35us fixed step overhead.
    - Tiny odd step counts are nudged to even so v7x's two TensorCores stay
      balanced (never below 128-lane tiles / 1 image per step).
    """
    hw128 = max(128, pl.cdiv(HW, 128) * 128)        # lane-rounded pixel extent
    hw_tile = int(min(hw128, max_lanes))            # multiple of 128
    nb = int(max(1, min(N, _MAX_IMAGES_PER_STEP, max_lanes // hw_tile)))

    n_steps = pl.cdiv(N, nb) * pl.cdiv(HW, hw_tile)
    if n_steps % 2 == 1 and n_steps < 8:
        if nb > 1:
            nb = int(pl.cdiv(nb, 2))                # ~doubles the batch groups
        elif hw_tile > 128 and pl.cdiv(HW, hw_tile) % 2 == 1:
            hw_tile = int(max(128, pl.cdiv(pl.cdiv(hw_tile, 2), 128) * 128))
    return nb, hw_tile


def update_net_forward(x_nchw, w1, w2, *, max_lanes=_DEFAULT_MAX_LANES):
    """x_nchw: (N, 3*state_size, H, W) in f32 or bf16.
    w1: (128, 48) or (128, 48, 1, 1)  -- first 1x1 conv weight (torch layout)
    w2: (16, 128) or (16, 128, 1, 1)  -- second 1x1 conv weight
    Returns (N, state_size, H, W) in x's dtype."""
    N, C, H, W = x_nchw.shape
    assert C == IN_CH, f"expected {IN_CH} input channels, got {C}"
    HW = H * W

    if w1.ndim == 4:                        # accept raw torch conv weights
        w1 = w1.reshape(HIDDEN, IN_CH)
    if w2.ndim == 4:
        w2 = w2.reshape(OUT_CH, HIDDEN)
    # Weights are tiny; cast them once to the activation dtype so bf16 inputs
    # take the native bf16 MXU path (accumulation stays f32 in-kernel).
    w1 = w1.astype(x_nchw.dtype)
    w2 = w2.astype(x_nchw.dtype)

    x3d = x_nchw.reshape(N, C, HW)          # free reshape, stays channels-first

    nb, hw_tile = _choose_tiling(N, HW, max_lanes)
    grid = (pl.cdiv(N, nb), pl.cdiv(HW, hw_tile))

    if nb == 1:
        x_block = (pl.Squeezed(), IN_CH, hw_tile)
        o_block = (pl.Squeezed(), OUT_CH, hw_tile)
    else:
        x_block = (nb, IN_CH, hw_tile)
        o_block = (nb, OUT_CH, hw_tile)

    out3d = pl.pallas_call(
        _update_net_kernel,
        out_shape=jax.ShapeDtypeStruct((N, OUT_CH, HW), x_nchw.dtype),
        grid_spec=pltpu.PrefetchScalarGridSpec(
            num_scalar_prefetch=0,
            grid=grid,
            in_specs=[
                pl.BlockSpec(x_block, lambda n, j: (n, 0, j)),
                # Constant index maps -> Pallas only DMAs the weights once.
                pl.BlockSpec((HIDDEN, IN_CH), lambda n, j: (0, 0)),
                pl.BlockSpec((OUT_CH, HIDDEN), lambda n, j: (0, 0)),
            ],
            out_specs=pl.BlockSpec(o_block, lambda n, j: (n, 0, j)),
        ),
        compiler_params=pltpu.CompilerParams(
            dimension_semantics=("parallel", "parallel"),
            vmem_limit_bytes=32 * 1024 * 1024,
        ),
    )(x3d, w1, w2)

    return out3d.reshape(N, OUT_CH, H, W)   # free reshape


def init_params(key):
    """Matches the PyTorch module's init: conv1 ~ uniform(+-1/sqrt(fan_in)),
    conv2 zero-initialized.  Weights kept in torch (out, in) layout."""
    bound = 1.0 / jnp.sqrt(float(IN_CH))
    w1 = jax.random.uniform(key, (HIDDEN, IN_CH), jnp.float32, -bound, bound)
    w2 = jnp.zeros((OUT_CH, HIDDEN), jnp.float32)
    return w1, w2


def _reference(x, w1, w2):
    h = jnp.einsum("dc,nchw->ndhw", w1, x)
    h = jnp.maximum(h, 0.0)
    return jnp.einsum("ed,ndhw->nehw", w2, h)


if __name__ == "__main__":
    key = jax.random.PRNGKey(0)
    k_x, k_w1, k_w2, k_x2 = jax.random.split(key, 4)

    bound = 1.0 / jnp.sqrt(float(IN_CH))
    w1 = jax.random.uniform(k_w1, (HIDDEN, IN_CH), jnp.float32, -bound, bound)
    w2_rand = jax.random.normal(k_w2, (OUT_CH, HIDDEN), jnp.float32) * 0.05

    # 1) f32 correctness with a nonzero second conv weight (H*W multiple of 128)
    N, H, W = 2, 16, 16
    x = jax.random.normal(k_x, (N, IN_CH, H, W), jnp.float32)
    out = jax.block_until_ready(update_net_forward(x, w1, w2_rand))
    ref = _reference(x, w1, w2_rand)
    assert out.shape == (N, STATE_SIZE, H, W)
    assert jnp.allclose(out, ref, atol=1e-4, rtol=1e-4)

    # 2) ragged / batched path: small images packed several per grid step,
    #    H*W (=64) not a multiple of 128, batch (=5) not a multiple of nb —
    #    no wrapper-side pad or slice, Pallas handles the ragged tail blocks.
    N2, H2, W2 = 5, 8, 8
    x2 = jax.random.normal(k_x2, (N2, IN_CH, H2, W2), jnp.float32)
    out2 = jax.block_until_ready(update_net_forward(x2, w1, w2_rand))
    ref2 = _reference(x2, w1, w2_rand)
    assert out2.shape == (N2, STATE_SIZE, H2, W2)
    assert jnp.allclose(out2, ref2, atol=1e-4, rtol=1e-4)

    # 3) bf16 in / bf16 out (halves HBM traffic; f32 accumulation inside)
    xb = x.astype(jnp.bfloat16)
    outb = jax.block_until_ready(update_net_forward(xb, w1, w2_rand))
    refb = _reference(xb.astype(jnp.float32),
                      w1.astype(jnp.bfloat16).astype(jnp.float32),
                      w2_rand.astype(jnp.bfloat16).astype(jnp.float32))
    assert outb.dtype == jnp.bfloat16
    assert jnp.allclose(outb.astype(jnp.float32), refb, atol=2e-2, rtol=2e-2)

    # 4) module-faithful init (zero-initialized out conv) -> all-zero update
    w1_init, w2_init = init_params(k_w1)
    out0 = jax.block_until_ready(update_net_forward(x, w1_init, w2_init))
    assert jnp.allclose(out0, jnp.zeros_like(out0))

    print("KERNEL_OK")
</pallas_src>

<mosaic_0001>
module attributes {stable_mosaic.version = 11 : i64} {
  func.func @_update_net_kernel(%arg0: i32, %arg1: i32, %arg2: memref<1x48x256xf32, #tpu.memory_space<vmem>>, %arg3: memref<128x48xf32, #tpu.memory_space<vmem>>, %arg4: memref<16x128xf32, #tpu.memory_space<vmem>>, %arg5: memref<1x16x256xf32, #tpu.memory_space<vmem>>) attributes {dimension_semantics = [#tpu.dimension_semantics<parallel>, #tpu.dimension_semantics<parallel>], iteration_bounds = array<i64: 2, 1>, scalar_prefetch = 0 : i64, scratch_operands = 0 : i64, tpu.core_type = #tpu.core_type<tc>, window_params = [{transform_indices = @transform_0, window_bounds = array<i64: 1, 48, 256>}, {pipeline_mode = #tpu.pipeline_mode<synchronous>, transform_indices = @transform_1, window_bounds = array<i64: 128, 48>}, {pipeline_mode = #tpu.pipeline_mode<synchronous>, transform_indices = @transform_2, window_bounds = array<i64: 16, 128>}, {transform_indices = @transform_3, window_bounds = array<i64: 1, 16, 256>}]} {
    %c0 = arith.constant 0 : index
    %c0_0 = arith.constant 0 : index
    %0 = vector.load %arg3[%c0, %c0_0] : memref<128x48xf32, #tpu.memory_space<vmem>>, vector<128x48xf32>
    %c0_1 = arith.constant 0 : index
    %c0_2 = arith.constant 0 : index
    %1 = vector.load %arg4[%c0_1, %c0_2] : memref<16x128xf32, #tpu.memory_space<vmem>>, vector<16x128xf32>
    %c0_3 = arith.constant 0 : index
    %c0_4 = arith.constant 0 : index
    %c0_5 = arith.constant 0 : index
    %2 = vector.load %arg2[%c0_3, %c0_4, %c0_5] : memref<1x48x256xf32, #tpu.memory_space<vmem>>, vector<1x48x256xf32>
    %3 = vector.shape_cast %2 : vector<1x48x256xf32> to vector<48x256xf32>
    %cst = arith.constant dense<0.000000e+00> : vector<128x256xf32>
    %4 = tpu.matmul %0, %3, %cst {dimension_numbers = #tpu.dot_dimension_numbers<[1], [0], [0], [1], [0, 0, 1, 1], [], []>} : vector<128x48xf32>, vector<48x256xf32>, vector<128x256xf32> -> vector<128x256xf32>
    %cst_6 = arith.constant 0.000000e+00 : f32
    %5 = vector.broadcast %cst_6 : f32 to vector<128x256xf32>
    %6 = arith.maximumf %4, %5 : vector<128x256xf32>
    %cst_7 = arith.constant dense<0.000000e+00> : vector<16x256xf32>
    %7 = tpu.matmul %1, %6, %cst_7 {dimension_numbers = #tpu.dot_dimension_numbers<[1], [0], [0], [1], [0, 0, 1, 1], [], []>} : vector<16x128xf32>, vector<128x256xf32>, vector<16x256xf32> -> vector<16x256xf32>
    %c0_8 = arith.constant 0 : index
    %c0_9 = arith.constant 0 : index
    %c0_10 = arith.constant 0 : index
    %8 = vector.load %arg5[%c0_8, %c0_9, %c0_10] : memref<1x16x256xf32, #tpu.memory_space<vmem>>, vector<1x16x256xf32>
    %9 = vector.shape_cast %8 : vector<1x16x256xf32> to vector<16x256xf32>
    %10 = vector.shape_cast %7 : vector<16x256xf32> to vector<1x16x256xf32>
    tpu.vector_store %arg5[%c0_8, %c0_9, %c0_10], %10 {strides = array<i32>} : memref<1x16x256xf32, #tpu.memory_space<vmem>>, vector<1x16x256xf32>,
    return
  }
  func.func @transform_0(%arg0: i32, %arg1: i32) -> (i32, i32, i32) {
    %c0_i32 = arith.constant 0 : i32
    %c0_i32_0 = arith.constant 0 : i32
    return %arg0, %c0_i32, %arg1 : i32, i32, i32
  }
  func.func @transform_1(%arg0: i32, %arg1: i32) -> (i32, i32) {
    %c0_i32 = arith.constant 0 : i32
    %c0_i32_0 = arith.constant 0 : i32
    %c0_i32_1 = arith.constant 0 : i32
    return %c0_i32, %c0_i32_0 : i32, i32
  }
  func.func @transform_2(%arg0: i32, %arg1: i32) -> (i32, i32) {
    %c0_i32 = arith.constant 0 : i32
    %c0_i32_0 = arith.constant 0 : i32
    %c0_i32_1 = arith.constant 0 : i32
    return %c0_i32, %c0_i32_0 : i32, i32
  }
  func.func @transform_3(%arg0: i32, %arg1: i32) -> (i32, i32, i32) {
    %c0_i32 = arith.constant 0 : i32
    %c0_i32_0 = arith.constant 0 : i32
    return %arg0, %c0_i32, %arg1 : i32, i32, i32
  }
}

</mosaic_0001>

<bundles_post_ra>
// kernel: tpu_custom_call.1
= control target key start
LH: loop header
LB: loop body
LE: loop exit
PB: predicated region body
PF: predicated region fallthrough
CT: control target
= control target key end

     0   :  { %8 = vsyncpa [#allocation3], 0  ;;  %s1119_s0 = inlined_call_operand.hbm [shape: f32[2,48,256], index: 0, kind: input, shape index: {}]   ;;  %s1120_s1 = inlined_call_operand.vmem [shape: f32[128,48], index: 1, kind: input, shape index: {}]   ;;  %s1121_s2 = inlined_call_operand.vmem [shape: f32[16,128], index: 2, kind: input, shape index: {}]   ;;  %s1122_s3 = inlined_call_operand.hbm [shape: f32[2,16,256], index: 3, kind: output, shape index: {}]  }
   0x1   :  { %10 = vsyncpa [#allocation3 + $0x1], 0 }
   0x2   :  { %11 = vsyncpa [#allocation4], 0 }
   0x3   :  { %13 = vsyncpa [#allocation4 + $0x1], 0  ;;  %s871_s12 = smov 0   ;;  %s873_s13 = smov 0  }
   0x4   :  { %s875_s14 = smov 0   ;;  %s877_s15 = smov 0  }
   0x5   :  { %s879_s16 = smov 0   ;;  %s881_s17 = smov 0  }
   0x6 LB: > { %s607_s18 = sadd.s32 4294967295, %s845_s17   ;;  %s608_s19 = sadd.s32 4294967294, %s845_s17   ;;  %s845_s17 = sphi %s881_s17, %s19_s17   ;;  %s841_s16 = sphi %s879_s16, %s1131_s16   ;;  %s837_s15 = sphi %s877_s15, %s1130_s15   ;;  %s833_s14 = sphi %s875_s14, %s1129_s14   ;;  %s829_s13 = sphi %s873_s13, %s1128_s13   ;;  %s825_s12 = sphi %s871_s12, %s1127_s12  }
   0x7   : > { %s31_s20 = sadd.s32 1, %s841_s16  ;;  %s40_s21 = sadd.s32 1, %s833_s14 }
   0x8   : > { %p33_p0 = scmp.ge.s32.totalorder %s31_s20, 2  ;;  %p47_p1 = scmp.ne.s32.totalorder %s833_s14, %s829_s13 }
   0x9   : > { %p48_p2 = scmp.eq.s32.totalorder %s845_s17, 0  ;;  %p53_p3 = scmp.ne.s32.totalorder %s829_s13, %s825_s12 }
   0xa   : > { %s1133_s20 = smov (%p33_p0, %s31_s20), 0  ;;  %p54_p5 = scmp.eq.s32.totalorder %s607_s18, 0 }
   0xb   : > { %p912_p4 = por %p48_p2, %p47_p1  ;;  %s35_s23 = ssub.s32 %s841_s16, %s1133_s20 }
   0xc   : > { %p121_p6 = scmp.eq.s32.totalorder %s607_s18, 1  ;;  %p38_p7 = scmp.eq.s32.totalorder %s35_s23, 0 }
   0xd   : > { %p918_p8 = por %p54_p5, %p53_p3  ;;  %p127_p10 = scmp.eq.s32.totalorder %s608_s19, 1 }
   0xe   : > { %p922_p9 = por %p121_p6, %p47_p1  ;;  %p610_p12 = scmp.ge.s32.totalorder %s845_s17, 2 }
   0xf   : > { %s927_s26 = scalar_select %p38_p7, %s833_s14, %s40_s21  }
  0x10   : > { %p929_p11 = por %p127_p10, %p53_p3  ;;  %p679_p13 = scmp.lt.s32.totalorder %s845_s17, 2 }
  0x11   : > { %s153_s28 = sand.u32 1, %s833_s14   ;;  %s665_s30 = smul.u32 96, %s841_s16 }
  0x12   : > { %s664_s29 = smul.u32 96, %s153_s28  ;;  %p672_p0 = pnand %p679_p13, %p912_p4 }
  0x13   : > { %s164_s6 = scalar_lea.hbm %s1119_s0, %s665_s30  ;;  %p612_p1 = scmp.ge.s32.totalorder %s845_s17, 1 }
  0x14   : > { %s157_s7 = scalar_lea.vmem [#allocation2], %s664_s29  ;;  %s165_s9 = sshll.u32 %s164_s6, 4  ;;  %s166_s9 = int_to_ptr.hbm [resolvable:$true] %s165_s9 }
  0x15   : > { %s167_s8 = sshll.u32 %s157_s7, 4  ;;  %s154_s10 = scalar_lea.sflag [#allocation3], %s153_s28  ;;  %s168_s8 = int_to_ptr.vmem [resolvable:$true] %s167_s8 }
  0x16   : > { %s847_s11 = smov 256   ;;  %s848_s18 = smov 16  }
  0x17   : > { %674 = dma.hbm_to_vmem [thread:$0]  (!%p672_p0), %s166_s9, 1536, %s168_s8, %s154_s10, %s847_s11, %s847_s11, %s848_s18  }
  0x18   : > { %p175_p2 = scmp.lt.s32.totalorder %s845_s17, 3 }
  0x1a   : > { %p176_p3 = pnand %p612_p1, %p175_p2 }
  0x1b   : > { %s945_s19 = sand.u32 (!%p176_p3), 1, %s829_s13  }
  0x1c   : > { %179 = sbr.rel (%p176_p3) target bundleno = 409 (0x199), region = 32  ;;  %s182_s22 = scalar_lea.sflag (!%p176_p3), [#allocation3], %s945_s19 }
  0x1d   : > { %s666_s21 = smul.u32 (!%p176_p3), 96, %s945_s19 }
  0x1f   : > { %s949_s23 = scalar_lea.vmem (!%p176_p3), [#allocation2], %s666_s21 }
  0x21   : > { %816 = dma.done.wait (%p918_p8), %s182_s22, 1536  }
  0x22   : > { %818 = vsyncadd (%p918_p8), %s182_s22, 4294965760  ;;  %v239_v0 = vld [vmem:[%s949_s23 + $0x50] sm:$0xff]  ;;  %v240_v1 = vld [vmem:[%s949_s23 + $0x58] sm:$0xff]  ;;  %vm241_vm0 = vcmask 392192   ;;  %s613_s4 = sshll.u32 %s945_s19, 5  ;;  %s651_s6 = sshll.u32 %s837_s15, 5 }
  0x23   : > { %v237_v2 = vld [vmem:[%s949_s23 + $0x40] sm:$0xff]  ;;  %300 = vmatpush.msra.mxu0 %v239_v0  ;;  %652 = vmatpush.msra.mxu2 %v239_v0  ;;  %v238_v3 = vld [vmem:[%s949_s23 + $0x48] sm:$0xff]  ;;  %v235_v4 = vld [vmem:[%s949_s23 + $0x30] sm:$0xff]  ;;  %s208_s5 = scalar_lea.vmem [#allocation5], %s613_s4  ;;  %s516_s9 = scalar_lea.hbm %s1122_s3, %s651_s6 }
  0x24   : > { %658 = vmatpush.msra.mxu3 %v240_v1  ;;  %365 = vmatpush.msra.mxu1 %v240_v1  ;;  %v236_v5 = vld [vmem:[%s949_s23 + $0x38] sm:$0xff]  ;;  %v233_v6 = vld [vmem:[%s949_s23 + $0x20] sm:$0xff]  ;;  %v234_v7 = vld [vmem:[%s949_s23 + $0x28] sm:$0xff]  ;;  %s517_s10 = sshll.u32 %s208_s5, 4  ;;  %s519_s11 = sshll.u32 %s516_s9, 4  ;;  %s518_s10 = int_to_ptr.vmem [resolvable:$true] %s517_s10  ;;  %s520_s11 = int_to_ptr.hbm [resolvable:$true] %s519_s11 }
  0x25   : > { %301 = vmatpush.msra.mxu0 %v237_v2  ;;  %653 = vmatpush.msra.mxu2 %v237_v2  ;;  %v231_v8 = vld [vmem:[%s949_s23 + $0x10] sm:$0xff]  ;;  %v232_v9 = vld [vmem:[%s949_s23 + $0x18] sm:$0xff]  ;;  %v229_v10 = vld [vmem:[%s949_s23] sm:$0xff]  ;;  %s503_s18 = scalar_lea.sflag [#allocation4], %s945_s19  ;;  %s777_s21 = sshra.s32 %s520_s11, 4  ;;  %s778_s21 = int_to_ptr.hbm [resolvable:$true] %s777_s21 }
  0x26   : > { %659 = vmatpush.msra.mxu3 %v238_v3  ;;  %366 = vmatpush.msra.mxu1 %v238_v3  ;;  %v230_v11 = vld [vmem:[%s949_s23 + $0x8] sm:$0xff]  ;;  %v211_v12 = vld [vmem:[%s1120_s1] sm:$0xff]  ;;  %v221_v13 = vld [vmem:[%s1120_s1 + $0x50] sm:$0xff]  ;;  %s779_s22 = scalar_lea.hbm %s778_s21, 32  ;;  %s783_s24 = scalar_lea.hbm %s1122_s3, 64 }
  0x27   : > { %302 = vmatpush.msra.mxu0 %v235_v4  ;;  %654 = vmatpush.msra.mxu2 %v235_v4  ;;  %v220_v14 = vld [vmem:[%s1120_s1 + $0x48] sm:$0xff]  ;;  %v222_v16 = vld [vmem:[%s1120_s1 + $0x58] sm:$0xff]  ;;  %v213_v17 = vld [vmem:[%s1120_s1 + $0x10] sm:$0xff]  ;;  %p780_p4 = scmp.ne.s32.totalorder %s778_s21, %s779_s22  ;;  %p784_p7 = scmp.lt.s32.totalorder %s778_s21, %s1122_s3 }
  0x28   : > { %660 = vmatpush.msra.mxu3 %v236_v5  ;;  %367 = vmatpush.msra.mxu1 %v236_v5  ;;  %v212_v15 = vld [vmem:[%s1120_s1 + $0x8] sm:$0xff]  ;;  %v223_v18 = vld [vmem:[%s1120_s1 + $0x60] sm:$0xff]  ;;  %v214_v19 = vld [vmem:[%s1120_s1 + $0x18] sm:$0xff]  ;;  %p785_p8 = scmp.lt.s32.totalorder %s783_s24, %s779_s22 }
  0x29   : > { %303 = vmatpush.msra.mxu0 %v233_v6  ;;  %655 = vmatpush.msra.mxu2 %v233_v6  ;;  %v224_v20 = vld [vmem:[%s1120_s1 + $0x68] sm:$0xff]  ;;  %v215_v21 = vld [vmem:[%s1120_s1 + $0x20] sm:$0xff]  ;;  %v225_v22 = vld [vmem:[%s1120_s1 + $0x70] sm:$0xff]  ;;  %p781_p5 = pnand %p780_p4, %p922_p9 }
  0x2a   : > { %661 = vmatpush.msra.mxu3 %v234_v7  ;;  %368 = vmatpush.msra.mxu1 %v234_v7  ;;  %v216_v23 = vld [vmem:[%s1120_s1 + $0x28] sm:$0xff]  ;;  %v226_v24 = vld [vmem:[%s1120_s1 + $0x78] sm:$0xff]  ;;  %v217_v25 = vld [vmem:[%s1120_s1 + $0x30] sm:$0xff]  ;;  %p786_p10 = por %p785_p8, %p784_p7 }
  0x2b   : > { %304 = vmatpush.msra.mxu0 %v231_v8  ;;  %656 = vmatpush.msra.mxu2 %v231_v8  ;;  %v218_v26 = vld [vmem:[%s1120_s1 + $0x38] sm:$0xff]  ;;  %v219_v27 = vld [vmem:[%s1120_s1 + $0x40] sm:$0xff]  ;;  %p782_p6 = pneg %p781_p5 }
  0x2c   : > { %662 = vmatpush.msra.mxu3 %v232_v9  ;;  %369 = vmatpush.msra.mxu1 %v232_v9 }
  0x2d   : > { %305 = vmatpush.msra.mxu0 %v229_v10  ;;  %657 = vmatpush.msra.mxu2 %v229_v10  ;;  %p787_p13 = pnand %p786_p10, %p782_p6 }
  0x2e   : > { %663 = vmatpush.msra.mxu3 %v230_v11  ;;  %614 = vmatmul.msk.f32.vlgmr.msra.gmra.mxu0 %vm241_vm0, %v211_v12 }
  0x2f   : > { %624 = vmatmul.msk.f32.vlgmr.msra.gmra.mxu2 %vm241_vm0, %v221_v13  ;;  %639 = vmatmul.msk.f32.vlgmr.msra.gmra.mxu3 %vm241_vm0, %v220_v14 }
  0x30   : > { %370 = vmatpush.msra.mxu1 %v230_v11 }
  0x31   : > { %630 = vmatmul.msk.f32.vlgmr.msra.gmra.mxu1 %vm241_vm0, %v211_v12 }
  0x36   : > { %615 = vmatmul.msk.f32.gmra.mxu0 %vm241_vm0, %v212_v15 }
  0x37   : > { %625 = vmatmul.msk.f32.gmra.mxu2 %vm241_vm0, %v222_v16  ;;  %640 = vmatmul.msk.f32.gmra.mxu3 %vm241_vm0, %v221_v13 }
  0x39   : > { %631 = vmatmul.msk.f32.gmra.mxu1 %vm241_vm0, %v212_v15 }
  0x3e   : > { %616 = vmatmul.msk.f32.gmra.mxu0 %vm241_vm0, %v213_v17 }
  0x3f   : > { %626 = vmatmul.msk.f32.gmra.mxu2 %vm241_vm0, %v223_v18  ;;  %641 = vmatmul.msk.f32.gmra.mxu3 %vm241_vm0, %v222_v16 }
  0x41   : > { %632 = vmatmul.msk.f32.gmra.mxu1 %vm241_vm0, %v213_v17 }
  0x46   : > { %617 = vmatmul.msk.f32.gmra.mxu0 %vm241_vm0, %v214_v19 }
  0x47   : > { %627 = vmatmul.msk.f32.gmra.mxu2 %vm241_vm0, %v224_v20  ;;  %642 = vmatmul.msk.f32.gmra.mxu3 %vm241_vm0, %v223_v18 }
  0x49   : > { %633 = vmatmul.msk.f32.gmra.mxu1 %vm241_vm0, %v214_v19 }
  0x4e   : > { %618 = vmatmul.msk.f32.gmra.mxu0 %vm241_vm0, %v215_v21 }
  0x4f   : > { %628 = vmatmul.msk.f32.gmra.mxu2 %vm241_vm0, %v225_v22  ;;  %643 = vmatmul.msk.f32.gmra.mxu3 %vm241_vm0, %v224_v20 }
  0x51   : > { %634 = vmatmul.msk.f32.gmra.mxu1 %vm241_vm0, %v215_v21 }
  0x56   : > { %619 = vmatmul.msk.f32.gmra.mxu0 %vm241_vm0, %v216_v23 }
  0x57   : > { %629 = vmatmul.msk.f32.gmra.mxu2 %vm241_vm0, %v226_v24  ;;  %644 = vmatmul.msk.f32.gmra.mxu3 %vm241_vm0, %v225_v22 }
  0x59   : > { %635 = vmatmul.msk.f32.gmra.mxu1 %vm241_vm0, %v216_v23 }
  0x5e   : > { %620 = vmatmul.msk.f32.gmra.mxu0 %vm241_vm0, %v217_v25 }
  0x5f   : > { %645 = vmatmul.msk.f32.gmra.mxu3 %vm241_vm0, %v226_v24 }
  0x61   : > { %636 = vmatmul.msk.f32.gmra.mxu1 %vm241_vm0, %v217_v25  ;;  %v227_v25 = vld [vmem:[%s1121_s2] sm:$0xff] }
  0x66   : > { %621 = vmatmul.msk.f32.gmra.mxu0 %vm241_vm0, %v218_v26 }
  0x69   : > { %637 = vmatmul.msk.f32.gmra.mxu1 %vm241_vm0, %v218_v26 }
  0x6e   : > { %622 = vmatmul.msk.f32.gmra.mxu0 %vm241_vm0, %v219_v27 }
  0x71   : > { %638 = vmatmul.msk.f32.gmra.mxu1 %vm241_vm0, %v219_v27 }
  0x76   : > { %623 = vmatmul.msk.f32.gmra.mxu0 %vm241_vm0, %v220_v14 }
  0xab   : > { %v1047_v28 = vpop.f32.mrf.mxu0 }
  0xae   : > { %v1049_v29 = vpop.f32.mrf.mxu1 }
  0xaf   : > { %v421_v24 = vmax.f32 %v1049_v29, 0.0  ;;  %v228_v29 = vld [vmem:[%s1121_s2 + $0x8] sm:$0xff] }
  0xb2   : > { %v337_v30 = vpop.f32.mrf.mxu2  ;;  %v399_v31 = vpop.f32.mrf.mxu3 }
  0xb3   : > { %v1051_v32 = vpop.f32.mrf.mxu0  ;;  %v440_v62 = vmax.f32 %v337_v30, 0.0  ;;  %v439_v7 = vmax.f32 %v399_v31, 0.0  ;;  %v420_v30 = vmax.f32 %v1047_v28, 0.0 }
  0xb4   : > { %v422_v27 = vmax.f32 %v1051_v32, 0.0 }
  0xb6   : > { %v1053_v33 = vpop.f32.mrf.mxu1 }
  0xb7   : > { %v423_v22 = vmax.f32 %v1053_v33, 0.0 }
  0xba   : > { %v340_v34 = vpop.f32.mrf.mxu2  ;;  %v402_v35 = vpop.f32.mrf.mxu3 }
  0xbb   : > { %v1055_v36 = vpop.f32.mrf.mxu0  ;;  %v442_v59 = vmax.f32 %v340_v34, 0.0  ;;  %v441_v5 = vmax.f32 %v402_v35, 0.0 }
  0xbc   : > { %v424_v26 = vmax.f32 %v1055_v36, 0.0 }
  0xbe   : > { %v1057_v37 = vpop.f32.mrf.mxu1 }
  0xbf   : > { %v425_v20 = vmax.f32 %v1057_v37, 0.0 }
  0xc2   : > { %v343_v38 = vpop.f32.mrf.mxu2  ;;  %v405_v39 = vpop.f32.mrf.mxu3 }
  0xc3   : > { %v1059_v40 = vpop.f32.mrf.mxu0  ;;  %v444_v57 = vmax.f32 %v343_v38, 0.0  ;;  %v443_v3 = vmax.f32 %v405_v39, 0.0 }
  0xc4   : > { %v426_v23 = vmax.f32 %v1059_v40, 0.0 }
  0xc6   : > { %v1061_v41 = vpop.f32.mrf.mxu1 }
  0xc7   : > { %v427_v18 = vmax.f32 %v1061_v41, 0.0 }
  0xca   : > { %v346_v42 = vpop.f32.mrf.mxu2  ;;  %v408_v43 = vpop.f32.mrf.mxu3 }
  0xcb   : > { %v1063_v44 = vpop.f32.mrf.mxu0  ;;  %v446_v56 = vmax.f32 %v346_v42, 0.0  ;;  %v445_v2 = vmax.f32 %v408_v43, 0.0 }
  0xcc   : > { %v428_v21 = vmax.f32 %v1063_v44, 0.0 }
  0xce   : > { %v384_v45 = vpop.f32.mrf.mxu1 }
  0xcf   : > { %v429_v16 = vmax.f32 %v384_v45, 0.0 }
  0xd2   : > { %v349_v46 = vpop.f32.mrf.mxu2  ;;  %v411_v47 = vpop.f32.mrf.mxu3 }
  0xd3   : > { %v322_v48 = vpop.f32.mrf.mxu0  ;;  %v448_v52 = vmax.f32 %v349_v46, 0.0  ;;  %v447_v1 = vmax.f32 %v411_v47, 0.0 }
  0xd4   : > { %v430_v19 = vmax.f32 %v322_v48, 0.0 }
  0xd6   : > { %v387_v49 = vpop.f32.mrf.mxu1 }
  0xd7   : > { %v431_v14 = vmax.f32 %v387_v49, 0.0 }
  0xda   : > { %v352_v50 = vpop.f32.mrf.mxu2  ;;  %v414_v51 = vpop.f32.mrf.mxu3 }
  0xdb   : > { %v450_v53 = vmax.f32 %v352_v50, 0.0  ;;  %v325_v54 = vpop.f32.mrf.mxu0  ;;  %v449_v63 = vmax.f32 %v414_v51, 0.0 }
  0xdc   : > { %v432_v17 = vmax.f32 %v325_v54, 0.0 }
  0xdd   : > { %452 = vmatpush.msrb.mxu2 %v450_v53 }
  0xde   : > { %v390_v55 = vpop.f32.mrf.mxu1 }
  0xdf   : > { %453 = vmatpush.msrb.mxu2 %v448_v52  ;;  %v433_v12 = vmax.f32 %v390_v55, 0.0 }
  0xe1   : > { %454 = vmatpush.msrb.mxu2 %v446_v56 }
  0xe2   : > { %v417_v58 = vpop.f32.mrf.mxu3 }
  0xe3   : > { %v451_v60 = vmax.f32 %v417_v58, 0.0  ;;  %455 = vmatpush.msrb.mxu2 %v444_v57  ;;  %v328_v61 = vpop.f32.mrf.mxu0 }
  0xe4   : > { %v434_v15 = vmax.f32 %v328_v61, 0.0 }
  0xe5   : > { %456 = vmatpush.msrb.mxu2 %v442_v59  ;;  %475 = vmatpush.msrb.mxu3 %v451_v60 }
  0xe6   : > { %v393_v0 = vpop.f32.mrf.mxu1 }
  0xe7   : > { %457 = vmatpush.msrb.mxu2 %v440_v62  ;;  %476 = vmatpush.msrb.mxu3 %v449_v63  ;;  %v435_v9 = vmax.f32 %v393_v0, 0.0 }
  0xe9   : > { %477 = vmatpush.msrb.mxu3 %v447_v1 }
  0xeb   : > { %478 = vmatpush.msrb.mxu3 %v445_v2  ;;  %v331_v4 = vpop.f32.mrf.mxu0 }
  0xec   : > { %v436_v13 = vmax.f32 %v331_v4, 0.0 }
  0xed   : > { %479 = vmatpush.msrb.mxu3 %v443_v3 }
  0xee   : > { %v396_v6 = vpop.f32.mrf.mxu1 }
  0xef   : > { %480 = vmatpush.msrb.mxu3 %v441_v5  ;;  %v437_v8 = vmax.f32 %v396_v6, 0.0 }
  0xf1   : > { %481 = vmatpush.msrb.mxu3 %v439_v7 }
  0xf3   : > { %482 = vmatpush.msrb.mxu3 %v437_v8  ;;  %v334_v10 = vpop.f32.mrf.mxu0 }
  0xf4   : > { %v438_v11 = vmax.f32 %v334_v10, 0.0 }
  0xf5   : > { %483 = vmatpush.msrb.mxu3 %v435_v9 }
  0xf6   : > { %458 = vmatpush.msrb.mxu2 %v438_v11 }
  0xf7   : > { %484 = vmatpush.msrb.mxu3 %v433_v12 }
  0xf8   : > { %459 = vmatpush.msrb.mxu2 %v436_v13 }
  0xf9   : > { %485 = vmatpush.msrb.mxu3 %v431_v14 }
  0xfa   : > { %460 = vmatpush.msrb.mxu2 %v434_v15 }
  0xfb   : > { %486 = vmatpush.msrb.mxu3 %v429_v16 }
  0xfc   : > { %461 = vmatpush.msrb.mxu2 %v432_v17 }
  0xfd   : > { %487 = vmatpush.msrb.mxu3 %v427_v18 }
  0xfe   : > { %462 = vmatpush.msrb.mxu2 %v430_v19 }
  0xff   : > { %488 = vmatpush.msrb.mxu3 %v425_v20 }
 0x100   : > { %463 = vmatpush.msrb.mxu2 %v428_v21 }
 0x101   : > { %489 = vmatpush.msrb.mxu3 %v423_v22 }
 0x102   : > { %464 = vmatpush.msrb.mxu2 %v426_v23 }
 0x103   : > { %490 = vmatpush.msrb.mxu3 %v421_v24 }
 0x104   : > { %465 = vmatpush.msrb.mxu2 %v424_v26  ;;  %491 = vmatmul.f32.vlgmr.msrb.gmra.mxu3 %v227_v25 }
 0x106   : > { %466 = vmatpush.msrb.mxu2 %v422_v27 }
 0x108   : > { %467 = vmatpush.msrb.mxu2 %v420_v30 }
 0x109   : > { %468 = vmatmul.f32.vlgmr.msrb.gmra.mxu2 %v227_v25 }
 0x10c   : > { %494 = vmatmul.f32.gmra.mxu3 %v228_v29 }
 0x111   : > { %471 = vmatmul.f32.gmra.mxu2 %v228_v29 }
 0x187   : > { %v492_v31 = vpop.f32.mrf.mxu3 }
 0x188   : > { %499 = vst [vmem:[%s208_s5 + $0x8] sm:$0xff] %v492_v31 }
 0x18c   : > { %v469_v32 = vpop.f32.mrf.mxu2 }
 0x18d   : > { %498 = vst [vmem:[%s208_s5] sm:$0xff] %v469_v32 }
 0x18f   : > { %v495_v28 = vpop.f32.mrf.mxu3 }
 0x190   : > { %501 = vst [vmem:[%s208_s5 + $0x18] sm:$0xff] %v495_v28 }
 0x194   : > { %v472_v33 = vpop.f32.mrf.mxu2 }
 0x195   : > { %500 = vst [vmem:[%s208_s5 + $0x10] sm:$0xff] %v472_v33 }
 0x196   : > { %790 = shalt.err (!%p787_p13)
}
 0x197   : > { %s849_s19 = smov 256   ;;  %s850_s30 = smov 16  }
 0x198   : > { %669 = dma.vmem_to_hbm [thread:$0]  (%p922_p9), %s518_s10, 512, %s520_s11, %s503_s18, %s849_s19, %s849_s19, %s850_s30  }
 0x199 PF: > { %s534_s4 = sand.u32 1, %s825_s12   ;;  %p676_p0 = pnand %p610_p12, %p929_p11 }
 0x19a   : > { %s535_s5 = scalar_lea.sflag [#allocation4], %s534_s4 }
 0x19b   : > { %p677_p1 = pneg %p676_p0 }
 0x19d   : > { %820 = dma.done.wait (%p677_p1), %s535_s5, 512  }
 0x19e   : > { %822 = vsyncadd (%p677_p1), %s535_s5, 4294966784  ;;  %s19_s17 = sadd.s32 1, %s845_s17   ;;  %s1127_s12 = smov %s829_s13 }
 0x19f   : > { %p16_p2 = scmp.ge.s32.totalorder %s19_s17, 4   ;;  %s1128_s13 = smov %s833_s14 }
 0x1a0   : > { %s1129_s14 = smov %s927_s26  ;;  %s1130_s15 = smov %s841_s16 }
 0x1a1   : > { %s1131_s16 = smov %s1133_s20  ;;  %18 = sbr.rel (!%p16_p2) target bundleno = 6 (0x6), region = 77 }
 0x1a6   :  { %541 = vsyncpa [#allocation3], 1 }
 0x1a7   :  { %543 = vsyncpa [#allocation3 + $0x1], 1 }
 0x1a8   :  { %544 = vsyncpa [#allocation4], 1 }
 0x1a9   :  { %546 = vsyncpa [#allocation4 + $0x1], 1 }

</bundles_post_ra>
